<compile_context>
chip_gen: v5e
topology: v5e:2x2
jax: 0.10.0
libtpu: 0.0.40
codegen_flags: <defaults>
</compile_context>

<pallas_src>
import functools

import jax
import jax.numpy as jnp
from jax.experimental import pallas as pl
from jax.experimental.pallas import tpu as pltpu


def _round_up(x, m):
    return (x + m - 1) // m * m


def _pick_tile(n, candidates=(512, 256, 128)):
    # n is a multiple of 128; prefer the biggest tile that divides it.
    for c in candidates:
        if n % c == 0:
            return c
    return n


# ------------------------- projection: Z = X @ W ---------------------------------

def _project_kernel(x_ref, w_ref, z_ref):
    x = x_ref[...].astype(jnp.bfloat16)
    w = w_ref[...].astype(jnp.bfloat16)
    z = jnp.dot(x, w, preferred_element_type=jnp.float32)
    z_ref[...] = z.astype(z_ref.dtype)


def _project(x_pad, w_pad, *, tm):
    n_pad, f_in = x_pad.shape
    f_out = w_pad.shape[1]
    return pl.pallas_call(
        _project_kernel,
        out_shape=jax.ShapeDtypeStruct((n_pad, f_out), jnp.bfloat16),
        grid_spec=pltpu.PrefetchScalarGridSpec(
            num_scalar_prefetch=0,
            grid=(n_pad // tm,),
            in_specs=[
                pl.BlockSpec((tm, f_in), lambda i: (i, 0)),
                pl.BlockSpec((f_in, f_out), lambda i: (0, 0)),
            ],
            out_specs=pl.BlockSpec((tm, f_out), lambda i: (i, 0)),
        ),
        compiler_params=pltpu.CompilerParams(
            dimension_semantics=("parallel",),
            vmem_limit_bytes=48 * 1024 * 1024,
        ),
        cost_estimate=pl.CostEstimate(
            flops=2 * n_pad * f_in * f_out,
            transcendentals=0,
            bytes_accessed=(x_pad.size * 2 + w_pad.size * 4 + n_pad * f_out * 2),
        ),
    )(x_pad, w_pad)


# ----------------- aggregation: Y = act(A_hat @ Z + b), tiled over A --------------

def _aggregate_kernel(a_ref, z_ref, b_ref, out_ref, acc_ref, *, last_layer, c_out):
    k = pl.program_id(1)

    @pl.when(k == 0)
    def _():
        acc_ref[...] = jnp.zeros_like(acc_ref)

    acc_ref[...] += jnp.dot(a_ref[...], z_ref[...],
                            preferred_element_type=jnp.float32)

    @pl.when(k == pl.num_programs(1) - 1)
    def _():
        y = acc_ref[...] + b_ref[...]                       # f32, lane-dense
        if last_layer:
            # log_softmax over the real c_out channels only (padded lanes masked).
            lane = jax.lax.broadcasted_iota(jnp.int32, y.shape, 1)
            valid = lane < c_out
            m = jnp.max(jnp.where(valid, y, jnp.float32(-1e30)),
                        axis=1, keepdims=True)
            s = jnp.sum(jnp.where(valid, jnp.exp(y - m), 0.0),
                        axis=1, keepdims=True)
            out_ref[...] = (y - (m + jnp.log(s))).astype(out_ref.dtype)
        else:
            # ReLU; dropout(p=0.5, training=False) is the identity.
            out_ref[...] = jnp.maximum(y, 0.0).astype(out_ref.dtype)


def _aggregate(a_pad, z_pad, b_pad, *, tm, tk, last_layer, c_out, out_dtype):
    n_pad = a_pad.shape[0]
    f_out = z_pad.shape[1]
    kernel = functools.partial(_aggregate_kernel,
                               last_layer=last_layer, c_out=c_out)
    return pl.pallas_call(
        kernel,
        out_shape=jax.ShapeDtypeStruct((n_pad, f_out), out_dtype),
        grid_spec=pltpu.PrefetchScalarGridSpec(
            num_scalar_prefetch=0,
            grid=(n_pad // tm, n_pad // tk),
            in_specs=[
                pl.BlockSpec((tm, tk), lambda i, k: (i, k)),
                pl.BlockSpec((tk, f_out), lambda i, k: (k, 0)),
                pl.BlockSpec((1, f_out), lambda i, k: (0, 0)),
            ],
            out_specs=pl.BlockSpec((tm, f_out), lambda i, k: (i, 0)),
            scratch_shapes=[pltpu.VMEM((tm, f_out), jnp.float32)],
        ),
        compiler_params=pltpu.CompilerParams(
            dimension_semantics=("parallel", "arbitrary"),
            vmem_limit_bytes=48 * 1024 * 1024,
        ),
        cost_estimate=pl.CostEstimate(
            flops=2 * n_pad * n_pad * f_out,
            transcendentals=(n_pad * f_out) if last_layer else 0,
            bytes_accessed=(a_pad.size * 2
                            + (n_pad // tm) * z_pad.size * 2
                            + n_pad * f_out * jnp.dtype(out_dtype).itemsize),
        ),
    )(a_pad, z_pad, b_pad)


# ------------------------------- full forward -------------------------------------

def gcn_forward(a_hat, x, params):
    """Forward pass matching GCN.forward (eval mode) for dense normalized A_hat."""
    (w1, b1), (w2, b2), (w3, b3) = params
    n = x.shape[0]
    c_out = w3.shape[1]

    n_pad = _round_up(n, 128)
    tm = _pick_tile(n_pad)
    tk = _pick_tile(n_pad)

    f_in = _round_up(x.shape[1], 128)
    h1 = _round_up(w1.shape[1], 128)
    h2 = _round_up(w2.shape[1], 128)
    f_out = _round_up(c_out, 128)

    def pad2(a, r, c):
        return jnp.pad(a, ((0, r - a.shape[0]), (0, c - a.shape[1])))

    a_p = pad2(a_hat, n_pad, n_pad).astype(jnp.bfloat16)
    x_p = pad2(x, n_pad, f_in).astype(jnp.bfloat16)

    w1_p = pad2(w1, f_in, h1).astype(jnp.float32)
    b1_p = pad2(b1.reshape(1, -1), 1, h1).astype(jnp.float32)
    w2_p = pad2(w2, h1, h2).astype(jnp.float32)
    b2_p = pad2(b2.reshape(1, -1), 1, h2).astype(jnp.float32)
    w3_p = pad2(w3, h2, f_out).astype(jnp.float32)
    b3_p = pad2(b3.reshape(1, -1), 1, f_out).astype(jnp.float32)

    # conv1 -> ReLU -> dropout(eval)
    z = _project(x_p, w1_p, tm=tm)
    h = _aggregate(a_p, z, b1_p, tm=tm, tk=tk,
                   last_layer=False, c_out=h1, out_dtype=jnp.bfloat16)
    # conv2 -> ReLU -> dropout(eval)
    z = _project(h, w2_p, tm=tm)
    h = _aggregate(a_p, z, b2_p, tm=tm, tk=tk,
                   last_layer=False, c_out=h2, out_dtype=jnp.bfloat16)
    # conv3 -> log_softmax(dim=1)
    z = _project(h, w3_p, tm=tm)
    out = _aggregate(a_p, z, b3_p, tm=tm, tk=tk,
                     last_layer=True, c_out=c_out, out_dtype=jnp.float32)

    return out[:n, :c_out]


# ------------------------------ plain-JAX glue -------------------------------------

def build_normalized_adjacency(edge_index, num_nodes):
    """Dense D^{-1/2}(A + I)D^{-1/2} matching torch_geometric's gcn_norm."""
    src = edge_index[0]
    dst = edge_index[1]
    a = jnp.zeros((num_nodes, num_nodes), jnp.float32).at[dst, src].add(1.0)
    # add_remaining_self_loops: only add a self loop where one is missing.
    diag = jnp.diagonal(a)
    a = a + jnp.diag(jnp.where(diag > 0, 0.0, 1.0))
    deg = jnp.sum(a, axis=1)
    dinv = jnp.where(deg > 0, 1.0 / jnp.sqrt(deg), 0.0)
    return dinv[:, None] * a * dinv[None, :]


def init_params(key, hidden_channels):
    """Deterministic glorot weights + zero biases (GCNConv default init)."""
    k1, k2, k3 = jax.random.split(key, 3)

    def glorot(k, shape):
        limit = jnp.sqrt(6.0 / (shape[0] + shape[1]))
        return jax.random.uniform(k, shape, jnp.float32, -limit, limit)

    w1 = glorot(k1, (1, hidden_channels))
    b1 = jnp.zeros((hidden_channels,), jnp.float32)
    w2 = glorot(k2, (hidden_channels, hidden_channels))
    b2 = jnp.zeros((hidden_channels,), jnp.float32)
    w3 = glorot(k3, (hidden_channels, 1))
    b3 = jnp.zeros((1,), jnp.float32)
    return ((w1, b1), (w2, b2), (w3, b3))


if __name__ == "__main__":
    num_nodes = 16
    hidden = 32

    key = jax.random.PRNGKey(0)
    kx, kp = jax.random.split(key)

    # Node features: [N, 1]
    x = jax.random.normal(kx, (num_nodes, 1), jnp.float32)

    # Bidirectional ring graph, edge_index shape [2, E]
    idx = jnp.arange(num_nodes)
    src = jnp.concatenate([idx, (idx + 1) % num_nodes])
    dst = jnp.concatenate([(idx + 1) % num_nodes, idx])
    edge_index = jnp.stack([src, dst]).astype(jnp.int32)  # (2, 32)

    a_hat = build_normalized_adjacency(edge_index, num_nodes)
    params = init_params(kp, hidden)

    out = gcn_forward(a_hat, x, params)
    out = jax.block_until_ready(out)

    assert out.shape == (num_nodes, 1)
    assert bool(jnp.all(jnp.isfinite(out)))
    print("KERNEL_OK")
</pallas_src>

<mosaic_0001>
module attributes {stable_mosaic.version = 11 : i64} {
  func.func @_project_kernel(%arg0: i32, %arg1: memref<128x128xbf16, #tpu.memory_space<vmem>>, %arg2: memref<128x128xf32, #tpu.memory_space<vmem>>, %arg3: memref<128x128xbf16, #tpu.memory_space<vmem>>) attributes {dimension_semantics = [#tpu.dimension_semantics<parallel>], iteration_bounds = array<i64: 1>, scalar_prefetch = 0 : i64, scratch_operands = 0 : i64, tpu.core_type = #tpu.core_type<tc>, window_params = [{transform_indices = @transform_0, window_bounds = array<i64: 128, 128>}, {pipeline_mode = #tpu.pipeline_mode<synchronous>, transform_indices = @transform_1, window_bounds = array<i64: 128, 128>}, {transform_indices = @transform_2, window_bounds = array<i64: 128, 128>}]} {
    %c0 = arith.constant 0 : index
    %c0_0 = arith.constant 0 : index
    %0 = vector.load %arg1[%c0, %c0_0] : memref<128x128xbf16, #tpu.memory_space<vmem>>, vector<128x128xbf16>
    %c0_1 = arith.constant 0 : index
    %c0_2 = arith.constant 0 : index
    %1 = vector.load %arg2[%c0_1, %c0_2] : memref<128x128xf32, #tpu.memory_space<vmem>>, vector<128x128xf32>
    %2 = arith.truncf %1 : vector<128x128xf32> to vector<128x128xbf16>
    %cst = arith.constant dense<0.000000e+00> : vector<128x128xf32>
    %3 = tpu.matmul %0, %2, %cst {dimension_numbers = #tpu.dot_dimension_numbers<[1], [0], [0], [1], [0, 0, 1, 1], [], []>} : vector<128x128xbf16>, vector<128x128xbf16>, vector<128x128xf32> -> vector<128x128xf32>
    %4 = arith.truncf %3 : vector<128x128xf32> to vector<128x128xbf16>
    %c0_3 = arith.constant 0 : index
    %c0_4 = arith.constant 0 : index
    %5 = vector.load %arg3[%c0_3, %c0_4] : memref<128x128xbf16, #tpu.memory_space<vmem>>, vector<128x128xbf16>
    tpu.vector_store %arg3[%c0_3, %c0_4], %4 {strides = array<i32>} : memref<128x128xbf16, #tpu.memory_space<vmem>>, vector<128x128xbf16>,
    return
  }
  func.func @transform_0(%arg0: i32) -> (i32, i32) {
    %c0_i32 = arith.constant 0 : i32
    %c0_i32_0 = arith.constant 0 : i32
    return %arg0, %c0_i32 : i32, i32
  }
  func.func @transform_1(%arg0: i32) -> (i32, i32) {
    %c0_i32 = arith.constant 0 : i32
    %c0_i32_0 = arith.constant 0 : i32
    %c0_i32_1 = arith.constant 0 : i32
    return %c0_i32, %c0_i32_0 : i32, i32
  }
  func.func @transform_2(%arg0: i32) -> (i32, i32) {
    %c0_i32 = arith.constant 0 : i32
    %c0_i32_0 = arith.constant 0 : i32
    return %arg0, %c0_i32 : i32, i32
  }
}

</mosaic_0001>

<bundles_post_ra>
// kernel: tpu_custom_call.1
= control target key start
LH: loop header
LB: loop body
LE: loop exit
PB: predicated region body
PF: predicated region fallthrough
CT: control target
= control target key end

     0   :  { %7 = vsyncpa [#allocation3], 0  ;;  %s466_s0 = inlined_call_operand.hbm [shape: bf16[128,128], index: 0, kind: input, shape index: {}]   ;;  %s467_s1 = inlined_call_operand.hbm [shape: f32[128,128], index: 1, kind: input, shape index: {}]   ;;  %s468_s2 = inlined_call_operand.hbm [shape: bf16[128,128], index: 2, kind: output, shape index: {}]  }
   0x1   :  { %8 = vsyncpa [#allocation6], 0 }
   0x2   :  { %9 = vsyncpa [#allocation4], 0  ;;  %s14_s11 = sshll.u32 %s466_s0, 4  ;;  %s429_s12 = smov [#allocation2]   ;;  %s15_s11 = int_to_ptr.hbm [resolvable:$true] %s14_s11 }
   0x3   :  { %s16_s13 = sshll.u32 %s429_s12, 4  ;;  %s27_s16 = sshll.u32 %s467_s1, 4  ;;  %s17_s13 = int_to_ptr.vmem [resolvable:$true] %s16_s13  ;;  %s28_s16 = int_to_ptr.hbm [resolvable:$true] %s27_s16 }
   0x4   :  { %s430_s17 = smov 64   ;;  %s431_s18 = smov 4  }
   0x5   :  { %22 = dma.hbm_to_vmem [thread:$0]  %s15_s11, 1024, %s17_s13, [#allocation3], %s430_s17, %s430_s17, %s431_s18  }
   0x6   :  { %s432_s19 = smov [#allocation5]   ;;  %s433_s21 = smov 128  }
   0x7   :  { %s29_s20 = sshll.u32 %s432_s19, 4  ;;  %s434_s0 = smov 8   ;;  %s30_s20 = int_to_ptr.vmem [resolvable:$true] %s29_s20 }
   0x8   :  { %35 = dma.hbm_to_vmem [thread:$0]  %s28_s16, 2048, %s30_s20, [#allocation6], %s433_s21, %s433_s21, %s434_s0  }
   0x9   :  { %423 = dma.done.wait [#allocation3], 1024  }
   0xa   :  { %424 = vsyncadd [#allocation3], 4294966272 }
   0xb   :  { %425 = dma.done.wait [#allocation6], 2048  }
   0xc   :  { %426 = vsyncadd [#allocation6], 4294965248  ;;  %v74_v0 = vld [vmem:[#allocation5 + $0x70] sm:$0xff]  ;;  %v75_v1 = vld [vmem:[#allocation5 + $0x78] sm:$0xff]  ;;  %s435_s1 = smov [#allocation7]   ;;  %s219_s25 = sshll.u32 %s468_s2, 4  ;;  %s220_s25 = int_to_ptr.hbm [resolvable:$true] %s219_s25 }
   0xd   :  { %v72_v2 = vld [vmem:[#allocation5 + $0x60] sm:$0xff]  ;;  %v83_v3 = vpack.c.bf16 %v75_v1, %v74_v0  ;;  %v73_v4 = vld [vmem:[#allocation5 + $0x68] sm:$0xff]  ;;  %v70_v6 = vld [vmem:[#allocation5 + $0x50] sm:$0xff]  ;;  %s217_s22 = sshll.u32 %s435_s1, 4  ;;  %s218_s22 = int_to_ptr.vmem [resolvable:$true] %s217_s22 }
   0xe   :  { %v82_v5 = vpack.c.bf16 %v73_v4, %v72_v2  ;;  %v71_v7 = vld [vmem:[#allocation5 + $0x58] sm:$0xff]  ;;  %v68_v9 = vld [vmem:[#allocation5 + $0x40] sm:$0xff]  ;;  %v69_v10 = vld [vmem:[#allocation5 + $0x48] sm:$0xff] }
   0xf   :  { %132 = vmatpush.bf16.msra.mxu0 %v83_v3  ;;  %320 = vmatpush.bf16.msra.mxu1 %v83_v3  ;;  %v81_v8 = vpack.c.bf16 %v71_v7, %v70_v6  ;;  %v80_v11 = vpack.c.bf16 %v69_v10, %v68_v9  ;;  %v66_v12 = vld [vmem:[#allocation5 + $0x30] sm:$0xff]  ;;  %v67_v13 = vld [vmem:[#allocation5 + $0x38] sm:$0xff]  ;;  %v64_v15 = vld [vmem:[#allocation5 + $0x20] sm:$0xff] }
  0x10   :  { %321 = vmatpush.bf16.msra.mxu2 %v83_v3  ;;  %322 = vmatpush.bf16.msra.mxu3 %v83_v3  ;;  %v79_v14 = vpack.c.bf16 %v67_v13, %v66_v12  ;;  %v65_v16 = vld [vmem:[#allocation5 + $0x28] sm:$0xff]  ;;  %v62_v18 = vld [vmem:[#allocation5 + $0x10] sm:$0xff]  ;;  %v63_v19 = vld [vmem:[#allocation5 + $0x18] sm:$0xff] }
  0x11   :  { %v78_v17 = vpack.c.bf16 %v65_v16, %v64_v15  ;;  %v77_v20 = vpack.c.bf16 %v63_v19, %v62_v18  ;;  %v60_v21 = vld [vmem:[#allocation5] sm:$0xff]  ;;  %v61_v22 = vld [vmem:[#allocation5 + $0x8] sm:$0xff]  ;;  %v267_v25 = vld [vmem:[#allocation2 + $0x10] sm:$0xff] }
  0x12   :  { %v76_v23 = vpack.c.bf16 %v61_v22, %v60_v21  ;;  %v265_v24 = vld [vmem:[#allocation2] sm:$0xff]  ;;  %v271_v27 = vld [vmem:[#allocation2 + $0x30] sm:$0xff]  ;;  %v266_v28 = vld [vmem:[#allocation2 + $0x8] sm:$0xff] }
  0x13   :  { %133 = vmatpush.bf16.msra.mxu0 %v82_v5  ;;  %323 = vmatpush.bf16.msra.mxu1 %v82_v5  ;;  %v269_v26 = vld [vmem:[#allocation2 + $0x20] sm:$0xff]  ;;  %v268_v29 = vld [vmem:[#allocation2 + $0x18] sm:$0xff]  ;;  %v270_v30 = vld [vmem:[#allocation2 + $0x28] sm:$0xff] }
  0x14   :  { %324 = vmatpush.bf16.msra.mxu2 %v82_v5  ;;  %325 = vmatpush.bf16.msra.mxu3 %v82_v5  ;;  %v272_v31 = vld [vmem:[#allocation2 + $0x38] sm:$0xff] }
  0x17   :  { %134 = vmatpush.bf16.msra.mxu0 %v81_v8  ;;  %326 = vmatpush.bf16.msra.mxu1 %v81_v8 }
  0x18   :  { %327 = vmatpush.bf16.msra.mxu2 %v81_v8  ;;  %328 = vmatpush.bf16.msra.mxu3 %v81_v8 }
  0x1b   :  { %135 = vmatpush.bf16.msra.mxu0 %v80_v11  ;;  %329 = vmatpush.bf16.msra.mxu1 %v80_v11 }
  0x1c   :  { %330 = vmatpush.bf16.msra.mxu2 %v80_v11  ;;  %331 = vmatpush.bf16.msra.mxu3 %v80_v11 }
  0x1f   :  { %136 = vmatpush.bf16.msra.mxu0 %v79_v14  ;;  %332 = vmatpush.bf16.msra.mxu1 %v79_v14 }
  0x20   :  { %333 = vmatpush.bf16.msra.mxu2 %v79_v14  ;;  %334 = vmatpush.bf16.msra.mxu3 %v79_v14 }
  0x23   :  { %137 = vmatpush.bf16.msra.mxu0 %v78_v17  ;;  %335 = vmatpush.bf16.msra.mxu1 %v78_v17 }
  0x24   :  { %336 = vmatpush.bf16.msra.mxu2 %v78_v17  ;;  %337 = vmatpush.bf16.msra.mxu3 %v78_v17 }
  0x27   :  { %138 = vmatpush.bf16.msra.mxu0 %v77_v20  ;;  %338 = vmatpush.bf16.msra.mxu1 %v77_v20 }
  0x28   :  { %339 = vmatpush.bf16.msra.mxu2 %v77_v20  ;;  %340 = vmatpush.bf16.msra.mxu3 %v77_v20 }
  0x2b   :  { %139 = vmatpush.bf16.msra.mxu0 %v76_v23  ;;  %341 = vmatpush.bf16.msra.mxu1 %v76_v23 }
  0x2c   :  { %342 = vmatpush.bf16.msra.mxu2 %v76_v23  ;;  %343 = vmatpush.bf16.msra.mxu3 %v76_v23 }
  0x2e   :  { %140 = vmatmul.bf16.vlgmr.msra.gmra.mxu0 %v265_v24  ;;  %150 = vmatmul.bf16.vlgmr.msra.gmra.mxu1 %v267_v25 }
  0x2f   :  { %160 = vmatmul.bf16.vlgmr.msra.gmra.mxu2 %v269_v26  ;;  %170 = vmatmul.bf16.vlgmr.msra.gmra.mxu3 %v271_v27 }
  0x3e   :  { %145 = vmatmul.bf16.gmra.mxu0 %v266_v28  ;;  %155 = vmatmul.bf16.gmra.mxu1 %v268_v29 }
  0x3f   :  { %165 = vmatmul.bf16.gmra.mxu2 %v270_v30  ;;  %175 = vmatmul.bf16.gmra.mxu3 %v272_v31 }
  0xab   :  { %v141_v32 = vpop.f32.mrf.mxu0  ;;  %v151_v33 = vpop.f32.mrf.mxu1 }
  0xb2   :  { %v161_v34 = vpop.f32.mrf.mxu2  ;;  %v171_v35 = vpop.f32.mrf.mxu3 }
  0xb3   :  { %v143_v36 = vpop.f32.mrf.mxu0  ;;  %v153_v37 = vpop.f32.mrf.mxu1 }
  0xb4   :  { %v276_v38 = vpack.c.bf16 %v143_v36, %v141_v32  ;;  %v286_v39 = vpack.c.bf16 %v153_v37, %v151_v33 }
  0xb6   :  { %277 = vst [vmem:[#allocation7] sm:$0xff] %v276_v38  }
  0xb7   :  { %314 = vst [vmem:[#allocation7 + $0x10] sm:$0xff] %v286_v39  }
  0xba   :  { %v163_v40 = vpop.f32.mrf.mxu2  ;;  %v173_v41 = vpop.f32.mrf.mxu3 }
  0xbb   :  { %v296_v42 = vpack.c.bf16 %v163_v40, %v161_v34  ;;  %v306_v43 = vpack.c.bf16 %v173_v41, %v171_v35  ;;  %v146_v44 = vpop.f32.mrf.mxu0  ;;  %v156_v45 = vpop.f32.mrf.mxu1 }
  0xbd   :  { %316 = vst [vmem:[#allocation7 + $0x20] sm:$0xff] %v296_v42  }
  0xbe   :  { %318 = vst [vmem:[#allocation7 + $0x30] sm:$0xff] %v306_v43  }
  0xc2   :  { %v166_v46 = vpop.f32.mrf.mxu2  ;;  %v176_v47 = vpop.f32.mrf.mxu3 }
  0xc3   :  { %v148_v48 = vpop.f32.mrf.mxu0  ;;  %v158_v49 = vpop.f32.mrf.mxu1 }
  0xc4   :  { %v281_v50 = vpack.c.bf16 %v148_v48, %v146_v44  ;;  %v291_v51 = vpack.c.bf16 %v158_v49, %v156_v45 }
  0xc6   :  { %313 = vst [vmem:[#allocation7 + $0x8] sm:$0xff] %v281_v50  }
  0xc7   :  { %315 = vst [vmem:[#allocation7 + $0x18] sm:$0xff] %v291_v51  }
  0xca   :  { %v168_v52 = vpop.f32.mrf.mxu2  ;;  %v178_v53 = vpop.f32.mrf.mxu3 }
  0xcb   :  { %v301_v54 = vpack.c.bf16 %v168_v52, %v166_v46  ;;  %v311_v55 = vpack.c.bf16 %v178_v53, %v176_v47 }
  0xcd   :  { %317 = vst [vmem:[#allocation7 + $0x28] sm:$0xff] %v301_v54  }
  0xce   :  { %319 = vst [vmem:[#allocation7 + $0x38] sm:$0xff] %v311_v55  }
  0xcf   :  { %225 = dma.vmem_to_hbm [thread:$0]  %s218_s22, 1024, %s220_s25, [#allocation4], %s430_s17, %s430_s17, %s431_s18  }
  0xd0   :  { %427 = dma.done.wait [#allocation4], 1024  }
  0xd1   :  { %428 = vsyncadd [#allocation4], 4294966272 }
  0xd2   :  { %230 = vsyncpa [#allocation3], 1 }
  0xd3   :  { %231 = vsyncpa [#allocation6], 1 }
  0xd4   :  { %232 = vsyncpa [#allocation4], 1 }

</bundles_post_ra>
